<compile_context>
chip_gen: v6e
topology: v6e:2x2x1
jax: 0.10.0
libtpu: 0.0.40
codegen_flags: <defaults>
</compile_context>

<pallas_src>
import functools
import math

import jax
import jax.numpy as jnp
from jax import lax
from jax.experimental import pallas as pl
from jax.experimental.pallas import tpu as pltpu

_EPS = 1e-19
_LANES = 128
_STREAM_TILE_R = 1024      # (1024,128) f32 block = 512 KiB per pipeline buffer
_TWO_PASS_TILE_R = 2048    # (2048,128) f32 block = 1 MiB per pipeline buffer


# ---------------------------------------------------------------------------
# Small helpers
# ---------------------------------------------------------------------------
def _vmem_capacity_bytes():
    """Per-core VMEM capacity; conservative fallback if the query fails."""
    try:
        cap = int(getattr(pltpu.get_tpu_info(), "vmem_capacity_bytes", 0))
        if cap > 0:
            return max(64 << 20, min(cap, 128 << 20))
    except Exception:
        pass
    return 64 << 20   # v7x per-core VMEM (most conservative generation)


def _valid_mask(row_offset, tile_r, n):
    """(tile_r, 128) bool mask: True where flat index row*128 + lane < n."""
    rows_full, rem = divmod(n, _LANES)     # python ints (n is static)
    r = lax.broadcasted_iota(jnp.int32, (tile_r, _LANES), 0) + row_offset
    m = r < rows_full
    if rem:
        l = lax.broadcasted_iota(jnp.int32, (tile_r, _LANES), 1)
        m = m | ((r == rows_full) & (l < rem))
    return m


def _fold_sum(a):
    # (tile_r,128) -> (8,128): layout-preserving reshape + VPU adds (no XLU).
    return a.reshape(a.shape[0] // 8, 8, _LANES).sum(axis=0)


def _fold_min(a):
    return a.reshape(a.shape[0] // 8, 8, _LANES).min(axis=0)


def _prep(a):
    """Flatten in native float dtype, pad flat to a multiple of 8*128 elems."""
    if a.dtype not in (jnp.float32, jnp.bfloat16, jnp.float16):
        a = a.astype(jnp.float32)
    flat = jnp.reshape(a, (-1,))
    pad = (-flat.shape[0]) % (8 * _LANES)
    if pad:
        flat = jnp.pad(flat, (0, pad))
    return flat.reshape(-1, _LANES)


# ---------------------------------------------------------------------------
# Streamed path: one HBM read, persistent VMEM stash, epilogue sqrt pass.
# ---------------------------------------------------------------------------
def _bt_streamed_kernel(x_ref, t_ref, out_ref,
                        x_stash, t_stash,
                        min_x_acc, sum_x_acc, min_t_acc, sum_t_acc,
                        *, n, tile_r, num_tiles, masked):
    i = pl.program_id(0)

    @pl.when(i == 0)
    def _():
        min_x_acc[...] = jnp.full_like(min_x_acc, jnp.inf)
        min_t_acc[...] = jnp.full_like(min_t_acc, jnp.inf)
        sum_x_acc[...] = jnp.zeros_like(sum_x_acc)
        sum_t_acc[...] = jnp.zeros_like(sum_t_acc)

    x_nat = x_ref[...]
    t_nat = t_ref[...]
    # Stash the tile (native dtype) for the VMEM-resident sqrt pass.
    x_stash[i] = x_nat
    t_stash[i] = t_nat

    x = x_nat.astype(jnp.float32)
    t = t_nat.astype(jnp.float32)
    if masked:
        m = _valid_mask(i * tile_r, tile_r, n)
        x_min_in = jnp.where(m, x, jnp.inf)
        t_min_in = jnp.where(m, t, jnp.inf)
        x_sum_in = jnp.where(m, x, 0.0)
        t_sum_in = jnp.where(m, t, 0.0)
    else:
        x_min_in = x_sum_in = x
        t_min_in = t_sum_in = t

    # Elementwise (VPU) folds into one-vreg accumulators; hidden under the DMA.
    min_x_acc[...] = jnp.minimum(min_x_acc[...], _fold_min(x_min_in))
    min_t_acc[...] = jnp.minimum(min_t_acc[...], _fold_min(t_min_in))
    sum_x_acc[...] = sum_x_acc[...] + _fold_sum(x_sum_in)
    sum_t_acc[...] = sum_t_acc[...] + _fold_sum(t_sum_in)

    @pl.when(i == pl.num_programs(0) - 1)
    def _():
        min_x = jnp.min(min_x_acc[...])
        min_t = jnp.min(min_t_acc[...])
        sum_x = jnp.sum(sum_x_acc[...])
        sum_t = jnp.sum(sum_t_acc[...])
        nf = jnp.float32(n)
        # c estimate only feeds the tiny eps*c term; the exact value
        # (accumulated below) drives the final 1/sqrt(c) scale.
        c_est = jnp.maximum((sum_x - nf * min_x) * (sum_t - nf * min_t), 0.0)
        eps_c = jnp.float32(_EPS) * c_est

        def body(j, carry):
            sq, sx, st = carry
            x1 = x_stash[j].astype(jnp.float32) - min_x
            t1 = t_stash[j].astype(jnp.float32) - min_t
            s = jnp.sqrt(jnp.abs(x1 * t1) + eps_c)
            if masked:
                m = _valid_mask(j * tile_r, tile_r, n)
                x1 = jnp.where(m, x1, 0.0)
                t1 = jnp.where(m, t1, 0.0)
                s = jnp.where(m, s, 0.0)
            return (sq + _fold_sum(s), sx + _fold_sum(x1), st + _fold_sum(t1))

        zero = jnp.zeros((8, _LANES), jnp.float32)
        sq, sx, st = lax.fori_loop(0, num_tiles, body, (zero, zero, zero))
        s_x = jnp.sum(sx)
        s_t = jnp.sum(st)
        c = s_x * s_t
        out_ref[0, 0] = jnp.float32(-2.0) * jnp.sum(sq) / jnp.sqrt(c)


def _bt_loss_streamed(xf, tf, n, tile_r, num_tiles, masked, vmem_limit):
    acc = pltpu.VMEM((8, _LANES), jnp.float32)
    kernel = functools.partial(_bt_streamed_kernel, n=n, tile_r=tile_r,
                               num_tiles=num_tiles, masked=masked)
    out = pl.pallas_call(
        kernel,
        out_shape=jax.ShapeDtypeStruct((1, 1), jnp.float32),
        grid_spec=pltpu.PrefetchScalarGridSpec(
            num_scalar_prefetch=0,
            grid=(num_tiles,),
            in_specs=[pl.BlockSpec((tile_r, _LANES), lambda i: (i, 0)),
                      pl.BlockSpec((tile_r, _LANES), lambda i: (i, 0))],
            out_specs=pl.BlockSpec((1, 1), lambda i: (0, 0),
                                   memory_space=pltpu.SMEM),
            scratch_shapes=[
                pltpu.VMEM((num_tiles, tile_r, _LANES), xf.dtype),
                pltpu.VMEM((num_tiles, tile_r, _LANES), tf.dtype),
                acc, acc, acc, acc,
            ],
        ),
        compiler_params=pltpu.CompilerParams(
            dimension_semantics=("arbitrary",),
            vmem_limit_bytes=int(vmem_limit)),
    )(xf, tf)
    return out[0, 0]


# ---------------------------------------------------------------------------
# Two-pass fallback: inputs too large for VMEM residency.
# ---------------------------------------------------------------------------
def _bt_pass1_kernel(x_ref, t_ref, stats_ref,
                     min_x_acc, sum_x_acc, min_t_acc, sum_t_acc,
                     *, n, tile_r, tps, masked):
    c = pl.program_id(0)
    i = pl.program_id(1)

    @pl.when(i == 0)
    def _():
        min_x_acc[...] = jnp.full_like(min_x_acc, jnp.inf)
        min_t_acc[...] = jnp.full_like(min_t_acc, jnp.inf)
        sum_x_acc[...] = jnp.zeros_like(sum_x_acc)
        sum_t_acc[...] = jnp.zeros_like(sum_t_acc)

    x = x_ref[...].astype(jnp.float32)
    t = t_ref[...].astype(jnp.float32)
    if masked:
        m = _valid_mask((c * tps + i) * tile_r, tile_r, n)
        x_min_in = jnp.where(m, x, jnp.inf)
        t_min_in = jnp.where(m, t, jnp.inf)
        x_sum_in = jnp.where(m, x, 0.0)
        t_sum_in = jnp.where(m, t, 0.0)
    else:
        x_min_in = x_sum_in = x
        t_min_in = t_sum_in = t

    min_x_acc[...] = jnp.minimum(min_x_acc[...], _fold_min(x_min_in))
    min_t_acc[...] = jnp.minimum(min_t_acc[...], _fold_min(t_min_in))
    sum_x_acc[...] = sum_x_acc[...] + _fold_sum(x_sum_in)
    sum_t_acc[...] = sum_t_acc[...] + _fold_sum(t_sum_in)

    @pl.when(i == pl.num_programs(1) - 1)
    def _():
        stats_ref[0, 0] = jnp.min(min_x_acc[...])
        stats_ref[0, 1] = jnp.sum(sum_x_acc[...])
        stats_ref[0, 2] = jnp.min(min_t_acc[...])
        stats_ref[0, 3] = jnp.sum(sum_t_acc[...])


def _bt_pass2_kernel(scal_ref, x_ref, t_ref, out_ref,
                     sq_acc, sx_acc, st_acc,
                     *, n, tile_r, tps, masked):
    # scal_ref (SMEM, (3,)): [min_x, min_t, eps * c_est]
    c = pl.program_id(0)
    i = pl.program_id(1)

    @pl.when(i == 0)
    def _():
        sq_acc[...] = jnp.zeros_like(sq_acc)
        sx_acc[...] = jnp.zeros_like(sx_acc)
        st_acc[...] = jnp.zeros_like(st_acc)

    min_x = scal_ref[0]
    min_t = scal_ref[1]
    eps_c = scal_ref[2]

    x1 = x_ref[...].astype(jnp.float32) - min_x
    t1 = t_ref[...].astype(jnp.float32) - min_t
    s = jnp.sqrt(jnp.abs(x1 * t1) + eps_c)
    if masked:
        m = _valid_mask((c * tps + i) * tile_r, tile_r, n)
        x1 = jnp.where(m, x1, 0.0)
        t1 = jnp.where(m, t1, 0.0)
        s = jnp.where(m, s, 0.0)

    # Exact sums of (x - min_x), (t - min_t) for the final 1/sqrt(c) scale.
    sq_acc[...] = sq_acc[...] + _fold_sum(s)
    sx_acc[...] = sx_acc[...] + _fold_sum(x1)
    st_acc[...] = st_acc[...] + _fold_sum(t1)

    @pl.when(i == pl.num_programs(1) - 1)
    def _():
        out_ref[0, 0] = jnp.sum(sq_acc[...])
        out_ref[0, 1] = jnp.sum(sx_acc[...])
        out_ref[0, 2] = jnp.sum(st_acc[...])


def _pick_two_pass_tiling(rows, max_tile=_TWO_PASS_TILE_R):
    """Pick (tile_rows, n_split) with an even tile count when possible."""
    for t in (max_tile, max_tile // 2, max_tile // 4):
        if t <= rows and (-(-rows // t)) % 2 == 0:
            return t, 2
    return min(max_tile, rows), 1


def _bt_loss_two_pass(xf, tf, n, vmem_limit):
    rows = xf.shape[0]
    tile_r, n_split = _pick_two_pass_tiling(rows)
    num_tiles = -(-rows // tile_r)
    tps = num_tiles // n_split
    masked = (n % (tile_r * _LANES)) != 0
    grid = (n_split, tps)

    def row_map(c, i, *_):
        return (c * tps + i, 0)

    def out_map(c, i, *_):
        return (c, 0)

    tile_spec = pl.BlockSpec((tile_r, _LANES), row_map)
    acc = pltpu.VMEM((8, _LANES), jnp.float32)
    cparams = pltpu.CompilerParams(
        # TODO(synk): evaluate pltpu.CORE_PARALLEL on the leading axis (v7x).
        dimension_semantics=("parallel", "arbitrary"),
        vmem_limit_bytes=int(vmem_limit))

    # --- pass 1: global min / sum of both tensors ---------------------------
    stats = pl.pallas_call(
        functools.partial(_bt_pass1_kernel, n=n, tile_r=tile_r, tps=tps,
                          masked=masked),
        out_shape=jax.ShapeDtypeStruct((n_split, 4), jnp.float32),
        grid_spec=pltpu.PrefetchScalarGridSpec(
            num_scalar_prefetch=0,
            grid=grid,
            in_specs=[tile_spec, tile_spec],
            out_specs=pl.BlockSpec((1, 4), out_map, memory_space=pltpu.SMEM),
            scratch_shapes=[acc, acc, acc, acc]),
        compiler_params=cparams,
    )(xf, tf)

    min_x = jnp.min(stats[:, 0])
    sum_x = jnp.sum(stats[:, 1])
    min_t = jnp.min(stats[:, 2])
    sum_t = jnp.sum(stats[:, 3])
    nf = jnp.float32(n)
    c_est = jnp.maximum((sum_x - nf * min_x) * (sum_t - nf * min_t), 0.0)
    scal = jnp.stack([min_x, min_t, jnp.float32(_EPS) * c_est]).astype(
        jnp.float32)

    # --- pass 2: sum sqrt(|x1*t1| + eps*c_est), exact s_x/s_t, per core ------
    part = pl.pallas_call(
        functools.partial(_bt_pass2_kernel, n=n, tile_r=tile_r, tps=tps,
                          masked=masked),
        out_shape=jax.ShapeDtypeStruct((n_split, 3), jnp.float32),
        grid_spec=pltpu.PrefetchScalarGridSpec(
            num_scalar_prefetch=1,
            grid=grid,
            in_specs=[tile_spec, tile_spec],
            out_specs=pl.BlockSpec((1, 3), out_map, memory_space=pltpu.SMEM),
            scratch_shapes=[acc, acc, acc]),
        compiler_params=cparams,
    )(scal, xf, tf)

    ssum = jnp.sum(part[:, 0])
    s_x = jnp.sum(part[:, 1])
    s_t = jnp.sum(part[:, 2])
    c = s_x * s_t
    return jnp.float32(-2.0) * ssum / jnp.sqrt(c)


# ---------------------------------------------------------------------------
# Public entry point
# ---------------------------------------------------------------------------
def bt_loss(x, t, *, force_two_pass=False):
    """Pallas implementation of BTLoss.forward(input, target) -> scalar f32."""
    assert x.shape == t.shape, "input and target must have the same shape"
    n = math.prod(x.shape)
    assert n > 0, "empty input"

    xf = _prep(x)
    tf = _prep(t)
    rows = xf.shape[0]

    cap = _vmem_capacity_bytes()
    budget = cap // 2                       # stay well inside physical VMEM

    tile_r = min(_STREAM_TILE_R, rows)
    num_tiles = -(-rows // tile_r)
    stash_bytes = num_tiles * tile_r * _LANES * (xf.dtype.itemsize +
                                                 tf.dtype.itemsize)
    # stash + double-buffered input blocks + headroom for f32 temporaries.
    stream_need = (stash_bytes
                   + 4 * tile_r * _LANES * max(xf.dtype.itemsize,
                                               tf.dtype.itemsize)
                   + 16 * tile_r * _LANES * 4
                   + (2 << 20))

    if (not force_two_pass) and stream_need <= budget:
        masked = (n % (tile_r * _LANES)) != 0
        return _bt_loss_streamed(xf, tf, n, tile_r, num_tiles, masked,
                                 vmem_limit=budget)
    return _bt_loss_two_pass(xf, tf, n, vmem_limit=min(budget, 32 << 20))


def _bt_loss_ref(x, t, eps=_EPS):
    """Pure-JAX reference mirroring the PyTorch module (for sanity check)."""
    x = jnp.asarray(x, jnp.float32)
    t = jnp.asarray(t, jnp.float32)
    t1 = t - jnp.min(t)
    t2 = t1 / jnp.sum(t1)
    o1 = x - jnp.min(x)
    o2 = o1 / jnp.sum(o1)
    return -2.0 * jnp.sum(jnp.sqrt(jnp.abs(o2 * t2) + eps))


if __name__ == "__main__":
    key = jax.random.PRNGKey(0)
    ks = jax.random.split(key, 8)

    def mk(shape, k1, k2):
        x = jax.nn.sigmoid(jax.random.normal(k1, shape, jnp.float32))
        t = (jax.random.uniform(k2, shape, jnp.float32) > 0.5).astype(
            jnp.float32)
        return x, t

    def check(name, got, want, tol):
        got = float(got)
        want = float(want)
        err = abs(got - want) / max(abs(want), 1e-12)
        assert err < tol, (name, got, want, err)

    f_auto = jax.jit(bt_loss)
    f_two = jax.jit(functools.partial(bt_loss, force_two_pass=True))

    # 1) Small NCHW case -> streamed single-tile path.
    x, t = mk((2, 4, 16, 16), ks[0], ks[1])
    check("small", jax.block_until_ready(f_auto(x, t)), _bt_loss_ref(x, t),
          1e-5)

    # 2) Same case in bf16 (native-dtype path, no wrapper f32 copy).
    xb, tb = x.astype(jnp.bfloat16), t.astype(jnp.bfloat16)
    check("bf16", jax.block_until_ready(f_auto(xb, tb)), _bt_loss_ref(xb, tb),
          2e-5)

    # 3) Odd (non multiple-of-1024) shape -> padded + masked single tile.
    x, t = mk((3, 5, 7, 11), ks[2], ks[3])
    check("odd-small", jax.block_until_ready(f_auto(x, t)),
          _bt_loss_ref(x, t), 1e-5)

    # 4) Odd mid-size shape: masked multi-tile streamed AND forced two-pass.
    x, t = mk((5, 3, 100, 100), ks[4], ks[5])
    ref = _bt_loss_ref(x, t)
    check("odd-mid streamed", jax.block_until_ready(f_auto(x, t)), ref, 1e-4)
    check("odd-mid two-pass", jax.block_until_ready(f_two(x, t)), ref, 1e-4)

    # 5) Larger case: multi-tile streamed AND forced tiled two-pass
    #    (2048-row tiles, one-vreg accumulators, 2-way parallel grid axis).
    x, t = mk((4, 16, 64, 128), ks[6], ks[7])
    ref = _bt_loss_ref(x, t)
    check("large streamed", jax.block_until_ready(f_auto(x, t)), ref, 2e-4)
    check("large two-pass", jax.block_until_ready(f_two(x, t)), ref, 2e-4)

    print("KERNEL_OK")
</pallas_src>

<mosaic_0001>
module attributes {stable_mosaic.version = 11 : i64} {
  func.func @_bt_streamed_kernel(%arg0: i32, %arg1: memref<16x128xf32, #tpu.memory_space<vmem>>, %arg2: memref<16x128xf32, #tpu.memory_space<vmem>>, %arg3: memref<1x1xf32, #tpu.memory_space<smem>>, %arg4: memref<1x16x128xf32, #tpu.memory_space<vmem>>, %arg5: memref<1x16x128xf32, #tpu.memory_space<vmem>>, %arg6: memref<8x128xf32, #tpu.memory_space<vmem>>, %arg7: memref<8x128xf32, #tpu.memory_space<vmem>>, %arg8: memref<8x128xf32, #tpu.memory_space<vmem>>, %arg9: memref<8x128xf32, #tpu.memory_space<vmem>>) attributes {dimension_semantics = [#tpu.dimension_semantics<arbitrary>], iteration_bounds = array<i64: 1>, scalar_prefetch = 0 : i64, scratch_operands = 6 : i64, tpu.core_type = #tpu.core_type<tc>, window_params = [{transform_indices = @transform_0, window_bounds = array<i64: 16, 128>}, {transform_indices = @transform_1, window_bounds = array<i64: 16, 128>}, {transform_indices = @transform_2, window_bounds = array<i64: 1, 1>}]} {
    %c0_i32 = arith.constant 0 : i32
    %0 = arith.cmpi eq, %arg0, %c0_i32 : i32
    %1 = arith.extui %0 : i1 to i32
    %c0_i32_0 = arith.constant 0 : i32
    %2 = arith.cmpi ne, %1, %c0_i32_0 : i32
    scf.if %2 {
      %cst_29 = arith.constant 0x7F800000 : f32
      %36 = vector.broadcast %cst_29 : f32 to vector<8x128xf32>
      %c0_30 = arith.constant 0 : index
      %c0_31 = arith.constant 0 : index
      %37 = vector.load %arg6[%c0_30, %c0_31] : memref<8x128xf32, #tpu.memory_space<vmem>>, vector<8x128xf32>
      tpu.vector_store %arg6[%c0_30, %c0_31], %36 {strides = array<i32>} : memref<8x128xf32, #tpu.memory_space<vmem>>, vector<8x128xf32>,
      %cst_32 = arith.constant 0x7F800000 : f32
      %38 = vector.broadcast %cst_32 : f32 to vector<8x128xf32>
      %c0_33 = arith.constant 0 : index
      %c0_34 = arith.constant 0 : index
      %39 = vector.load %arg8[%c0_33, %c0_34] : memref<8x128xf32, #tpu.memory_space<vmem>>, vector<8x128xf32>
      tpu.vector_store %arg8[%c0_33, %c0_34], %38 {strides = array<i32>} : memref<8x128xf32, #tpu.memory_space<vmem>>, vector<8x128xf32>,
      %cst_35 = arith.constant 0.000000e+00 : f32
      %40 = vector.broadcast %cst_35 : f32 to vector<8x128xf32>
      %c0_36 = arith.constant 0 : index
      %c0_37 = arith.constant 0 : index
      %41 = vector.load %arg7[%c0_36, %c0_37] : memref<8x128xf32, #tpu.memory_space<vmem>>, vector<8x128xf32>
      tpu.vector_store %arg7[%c0_36, %c0_37], %40 {strides = array<i32>} : memref<8x128xf32, #tpu.memory_space<vmem>>, vector<8x128xf32>,
      %cst_38 = arith.constant 0.000000e+00 : f32
      %42 = vector.broadcast %cst_38 : f32 to vector<8x128xf32>
      %c0_39 = arith.constant 0 : index
      %c0_40 = arith.constant 0 : index
      %43 = vector.load %arg9[%c0_39, %c0_40] : memref<8x128xf32, #tpu.memory_space<vmem>>, vector<8x128xf32>
      tpu.vector_store %arg9[%c0_39, %c0_40], %42 {strides = array<i32>} : memref<8x128xf32, #tpu.memory_space<vmem>>, vector<8x128xf32>,
    } else {
    }
    %c0 = arith.constant 0 : index
    %c0_1 = arith.constant 0 : index
    %3 = vector.load %arg1[%c0, %c0_1] : memref<16x128xf32, #tpu.memory_space<vmem>>, vector<16x128xf32>
    %c0_2 = arith.constant 0 : index
    %c0_3 = arith.constant 0 : index
    %4 = vector.load %arg2[%c0_2, %c0_3] : memref<16x128xf32, #tpu.memory_space<vmem>>, vector<16x128xf32>
    %5 = arith.index_cast %arg0 : i32 to index
    %c0_4 = arith.constant 0 : index
    %c0_5 = arith.constant 0 : index
    %6 = vector.load %arg4[%5, %c0_4, %c0_5] : memref<1x16x128xf32, #tpu.memory_space<vmem>>, vector<1x16x128xf32>
    %7 = vector.shape_cast %6 : vector<1x16x128xf32> to vector<16x128xf32>
    %8 = vector.shape_cast %3 : vector<16x128xf32> to vector<1x16x128xf32>
    tpu.vector_store %arg4[%5, %c0_4, %c0_5], %8 {strides = array<i32>} : memref<1x16x128xf32, #tpu.memory_space<vmem>>, vector<1x16x128xf32>,
    %9 = arith.index_cast %arg0 : i32 to index
    %c0_6 = arith.constant 0 : index
    %c0_7 = arith.constant 0 : index
    %10 = vector.load %arg5[%9, %c0_6, %c0_7] : memref<1x16x128xf32, #tpu.memory_space<vmem>>, vector<1x16x128xf32>
    %11 = vector.shape_cast %10 : vector<1x16x128xf32> to vector<16x128xf32>
    %12 = vector.shape_cast %4 : vector<16x128xf32> to vector<1x16x128xf32>
    tpu.vector_store %arg5[%9, %c0_6, %c0_7], %12 {strides = array<i32>} : memref<1x16x128xf32, #tpu.memory_space<vmem>>, vector<1x16x128xf32>,
    %c0_8 = arith.constant 0 : index
    %c0_9 = arith.constant 0 : index
    %13 = vector.load %arg6[%c0_8, %c0_9] : memref<8x128xf32, #tpu.memory_space<vmem>>, vector<8x128xf32>
    %14 = vector.shape_cast %3 : vector<16x128xf32> to vector<2x8x128xf32>
    %cst = arith.constant dense<0x7F800000> : vector<8x128xf32>
    %15 = vector.multi_reduction <minimumf>, %14, %cst [0] : vector<2x8x128xf32> to vector<8x128xf32>
    %16 = arith.minimumf %13, %15 : vector<8x128xf32>
    %c0_10 = arith.constant 0 : index
    %c0_11 = arith.constant 0 : index
    %17 = vector.load %arg6[%c0_10, %c0_11] : memref<8x128xf32, #tpu.memory_space<vmem>>, vector<8x128xf32>
    tpu.vector_store %arg6[%c0_10, %c0_11], %16 {strides = array<i32>} : memref<8x128xf32, #tpu.memory_space<vmem>>, vector<8x128xf32>,
    %c0_12 = arith.constant 0 : index
    %c0_13 = arith.constant 0 : index
    %18 = vector.load %arg8[%c0_12, %c0_13] : memref<8x128xf32, #tpu.memory_space<vmem>>, vector<8x128xf32>
    %19 = vector.shape_cast %4 : vector<16x128xf32> to vector<2x8x128xf32>
    %cst_14 = arith.constant dense<0x7F800000> : vector<8x128xf32>
    %20 = vector.multi_reduction <minimumf>, %19, %cst_14 [0] : vector<2x8x128xf32> to vector<8x128xf32>
    %21 = arith.minimumf %18, %20 : vector<8x128xf32>
    %c0_15 = arith.constant 0 : index
    %c0_16 = arith.constant 0 : index
    %22 = vector.load %arg8[%c0_15, %c0_16] : memref<8x128xf32, #tpu.memory_space<vmem>>, vector<8x128xf32>
    tpu.vector_store %arg8[%c0_15, %c0_16], %21 {strides = array<i32>} : memref<8x128xf32, #tpu.memory_space<vmem>>, vector<8x128xf32>,
    %c0_17 = arith.constant 0 : index
    %c0_18 = arith.constant 0 : index
    %23 = vector.load %arg7[%c0_17, %c0_18] : memref<8x128xf32, #tpu.memory_space<vmem>>, vector<8x128xf32>
    %24 = vector.shape_cast %3 : vector<16x128xf32> to vector<2x8x128xf32>
    %cst_19 = arith.constant dense<0.000000e+00> : vector<8x128xf32>
    %25 = vector.multi_reduction <add>, %24, %cst_19 [0] : vector<2x8x128xf32> to vector<8x128xf32>
    %26 = arith.addf %23, %25 : vector<8x128xf32>
    %c0_20 = arith.constant 0 : index
    %c0_21 = arith.constant 0 : index
    %27 = vector.load %arg7[%c0_20, %c0_21] : memref<8x128xf32, #tpu.memory_space<vmem>>, vector<8x128xf32>
    tpu.vector_store %arg7[%c0_20, %c0_21], %26 {strides = array<i32>} : memref<8x128xf32, #tpu.memory_space<vmem>>, vector<8x128xf32>,
    %c0_22 = arith.constant 0 : index
    %c0_23 = arith.constant 0 : index
    %28 = vector.load %arg9[%c0_22, %c0_23] : memref<8x128xf32, #tpu.memory_space<vmem>>, vector<8x128xf32>
    %29 = vector.shape_cast %4 : vector<16x128xf32> to vector<2x8x128xf32>
    %cst_24 = arith.constant dense<0.000000e+00> : vector<8x128xf32>
    %30 = vector.multi_reduction <add>, %29, %cst_24 [0] : vector<2x8x128xf32> to vector<8x128xf32>
    %31 = arith.addf %28, %30 : vector<8x128xf32>
    %c0_25 = arith.constant 0 : index
    %c0_26 = arith.constant 0 : index
    %32 = vector.load %arg9[%c0_25, %c0_26] : memref<8x128xf32, #tpu.memory_space<vmem>>, vector<8x128xf32>
    tpu.vector_store %arg9[%c0_25, %c0_26], %31 {strides = array<i32>} : memref<8x128xf32, #tpu.memory_space<vmem>>, vector<8x128xf32>,
    %c0_i32_27 = arith.constant 0 : i32
    %33 = arith.cmpi eq, %arg0, %c0_i32_27 : i32
    %34 = arith.extui %33 : i1 to i32
    %c0_i32_28 = arith.constant 0 : i32
    %35 = arith.cmpi ne, %34, %c0_i32_28 : i32
    scf.if %35 {
      %c0_29 = arith.constant 0 : index
      %c0_30 = arith.constant 0 : index
      %36 = vector.load %arg6[%c0_29, %c0_30] : memref<8x128xf32, #tpu.memory_space<vmem>>, vector<8x128xf32>
      %37 = vector.shape_cast %36 : vector<8x128xf32> to vector<1x8x128xf32>
      %cst_31 = arith.constant dense<0x7F800000> : vector<1xf32>
      %38 = vector.multi_reduction <minimumf>, %37, %cst_31 [1, 2] : vector<1x8x128xf32> to vector<1xf32>
      %39 = vector.shape_cast %38 : vector<1xf32> to vector<1x1x1xf32>
      %40 = vector.extract %39[0, 0, 0] : f32 from vector<1x1x1xf32>
      %c0_32 = arith.constant 0 : index
      %c0_33 = arith.constant 0 : index
      %41 = vector.load %arg8[%c0_32, %c0_33] : memref<8x128xf32, #tpu.memory_space<vmem>>, vector<8x128xf32>
      %42 = vector.shape_cast %41 : vector<8x128xf32> to vector<1x8x128xf32>
      %cst_34 = arith.constant dense<0x7F800000> : vector<1xf32>
      %43 = vector.multi_reduction <minimumf>, %42, %cst_34 [1, 2] : vector<1x8x128xf32> to vector<1xf32>
      %44 = vector.shape_cast %43 : vector<1xf32> to vector<1x1x1xf32>
      %45 = vector.extract %44[0, 0, 0] : f32 from vector<1x1x1xf32>
      %c0_35 = arith.constant 0 : index
      %c0_36 = arith.constant 0 : index
      %46 = vector.load %arg7[%c0_35, %c0_36] : memref<8x128xf32, #tpu.memory_space<vmem>>, vector<8x128xf32>
      %47 = vector.shape_cast %46 : vector<8x128xf32> to vector<1x8x128xf32>
      %cst_37 = arith.constant dense<0.000000e+00> : vector<1xf32>
      %48 = vector.multi_reduction <add>, %47, %cst_37 [1, 2] : vector<1x8x128xf32> to vector<1xf32>
      %49 = vector.shape_cast %48 : vector<1xf32> to vector<1x1x1xf32>
      %50 = vector.extract %49[0, 0, 0] : f32 from vector<1x1x1xf32>
      %c0_38 = arith.constant 0 : index
      %c0_39 = arith.constant 0 : index
      %51 = vector.load %arg9[%c0_38, %c0_39] : memref<8x128xf32, #tpu.memory_space<vmem>>, vector<8x128xf32>
      %52 = vector.shape_cast %51 : vector<8x128xf32> to vector<1x8x128xf32>
      %cst_40 = arith.constant dense<0.000000e+00> : vector<1xf32>
      %53 = vector.multi_reduction <add>, %52, %cst_40 [1, 2] : vector<1x8x128xf32> to vector<1xf32>
      %54 = vector.shape_cast %53 : vector<1xf32> to vector<1x1x1xf32>
      %55 = vector.extract %54[0, 0, 0] : f32 from vector<1x1x1xf32>
      %cst_41 = arith.constant 2.048000e+03 : f32
      %56 = arith.mulf %cst_41, %40 : f32
      %57 = arith.subf %50, %56 : f32
      %cst_42 = arith.constant 2.048000e+03 : f32
      %58 = arith.mulf %cst_42, %45 : f32
      %59 = arith.subf %55, %58 : f32
      %60 = arith.mulf %57, %59 : f32
      %cst_43 = arith.constant 0.000000e+00 : f32
      %61 = arith.maximumf %60, %cst_43 : f32
      %cst_44 = arith.constant 9.99999968E-20 : f32
      %62 = arith.mulf %cst_44, %61 : f32
      %cst_45 = arith.constant 0.000000e+00 : f32
      %63 = vector.broadcast %cst_45 : f32 to vector<8x128xf32>
      %c0_i32_46 = arith.constant 0 : i32
      %64 = arith.index_cast %c0_i32_46 : i32 to index
      %c0_47 = arith.constant 0 : index
      %c0_48 = arith.constant 0 : index
      %65 = vector.load %arg4[%64, %c0_47, %c0_48] : memref<1x16x128xf32, #tpu.memory_space<vmem>>, vector<1x16x128xf32>
      %66 = vector.shape_cast %65 : vector<1x16x128xf32> to vector<16x128xf32>
      %67 = vector.broadcast %40 : f32 to vector<16x128xf32>
      %68 = arith.subf %66, %67 : vector<16x128xf32>
      %69 = arith.index_cast %c0_i32_46 : i32 to index
      %c0_49 = arith.constant 0 : index
      %c0_50 = arith.constant 0 : index
      %70 = vector.load %arg5[%69, %c0_49, %c0_50] : memref<1x16x128xf32, #tpu.memory_space<vmem>>, vector<1x16x128xf32>
      %71 = vector.shape_cast %70 : vector<1x16x128xf32> to vector<16x128xf32>
      %72 = vector.broadcast %45 : f32 to vector<16x128xf32>
      %73 = arith.subf %71, %72 : vector<16x128xf32>
      %74 = arith.mulf %68, %73 : vector<16x128xf32>
      %75 = math.absf %74 : vector<16x128xf32>
      %76 = vector.broadcast %62 : f32 to vector<16x128xf32>
      %77 = arith.addf %75, %76 : vector<16x128xf32>
      %78 = math.sqrt %77 : vector<16x128xf32>
      %79 = vector.shape_cast %78 : vector<16x128xf32> to vector<2x8x128xf32>
      %cst_51 = arith.constant dense<0.000000e+00> : vector<8x128xf32>
      %80 = vector.multi_reduction <add>, %79, %cst_51 [0] : vector<2x8x128xf32> to vector<8x128xf32>
      %81 = arith.addf %63, %80 : vector<8x128xf32>
      %82 = vector.shape_cast %68 : vector<16x128xf32> to vector<2x8x128xf32>
      %cst_52 = arith.constant dense<0.000000e+00> : vector<8x128xf32>
      %83 = vector.multi_reduction <add>, %82, %cst_52 [0] : vector<2x8x128xf32> to vector<8x128xf32>
      %84 = arith.addf %63, %83 : vector<8x128xf32>
      %85 = vector.shape_cast %73 : vector<16x128xf32> to vector<2x8x128xf32>
      %cst_53 = arith.constant dense<0.000000e+00> : vector<8x128xf32>
      %86 = vector.multi_reduction <add>, %85, %cst_53 [0] : vector<2x8x128xf32> to vector<8x128xf32>
      %87 = arith.addf %63, %86 : vector<8x128xf32>
      %c1_i32 = arith.constant 1 : i32
      %88 = vector.shape_cast %84 : vector<8x128xf32> to vector<1x8x128xf32>
      %cst_54 = arith.constant dense<0.000000e+00> : vector<1xf32>
      %89 = vector.multi_reduction <add>, %88, %cst_54 [1, 2] : vector<1x8x128xf32> to vector<1xf32>
      %90 = vector.shape_cast %89 : vector<1xf32> to vector<1x1x1xf32>
      %91 = vector.extract %90[0, 0, 0] : f32 from vector<1x1x1xf32>
      %92 = vector.shape_cast %87 : vector<8x128xf32> to vector<1x8x128xf32>
      %cst_55 = arith.constant dense<0.000000e+00> : vector<1xf32>
      %93 = vector.multi_reduction <add>, %92, %cst_55 [1, 2] : vector<1x8x128xf32> to vector<1xf32>
      %94 = vector.shape_cast %93 : vector<1xf32> to vector<1x1x1xf32>
      %95 = vector.extract %94[0, 0, 0] : f32 from vector<1x1x1xf32>
      %96 = arith.mulf %91, %95 : f32
      %97 = vector.shape_cast %81 : vector<8x128xf32> to vector<1x8x128xf32>
      %cst_56 = arith.constant dense<0.000000e+00> : vector<1xf32>
      %98 = vector.multi_reduction <add>, %97, %cst_56 [1, 2] : vector<1x8x128xf32> to vector<1xf32>
      %99 = vector.shape_cast %98 : vector<1xf32> to vector<1x1x1xf32>
      %100 = vector.extract %99[0, 0, 0] : f32 from vector<1x1x1xf32>
      %cst_57 = arith.constant -2.000000e+00 : f32
      %101 = arith.mulf %cst_57, %100 : f32
      %102 = math.sqrt %96 : f32
      %103 = arith.divf %101, %102 : f32
      %c0_58 = arith.constant 0 : index
      %c0_59 = arith.constant 0 : index
      %104 = memref.load %arg3[%c0_58, %c0_59] : memref<1x1xf32, #tpu.memory_space<smem>>
      memref.store %103, %arg3[%c0_58, %c0_59] : memref<1x1xf32, #tpu.memory_space<smem>>
    } else {
    }
    return
  }
  func.func @transform_0(%arg0: i32) -> (i32, i32) {
    %c0_i32 = arith.constant 0 : i32
    %c0_i32_0 = arith.constant 0 : i32
    return %arg0, %c0_i32 : i32, i32
  }
  func.func @transform_1(%arg0: i32) -> (i32, i32) {
    %c0_i32 = arith.constant 0 : i32
    %c0_i32_0 = arith.constant 0 : i32
    return %arg0, %c0_i32 : i32, i32
  }
  func.func @transform_2(%arg0: i32) -> (i32, i32) {
    %c0_i32 = arith.constant 0 : i32
    %c0_i32_0 = arith.constant 0 : i32
    %c0_i32_1 = arith.constant 0 : i32
    return %c0_i32, %c0_i32_0 : i32, i32
  }
}

</mosaic_0001>

<bundles_post_ra>
// kernel: bt_loss.1
= control target key start
LH: loop header
LB: loop body
LE: loop exit
PB: predicated region body
PF: predicated region fallthrough
CT: control target
= control target key end

     0   :  { %s261_s0 = inlined_call_operand.vmem [shape: f32[16,128], index: 0, kind: input, shape index: {}]   ;;  %s262_s1 = inlined_call_operand.vmem [shape: f32[16,128], index: 1, kind: input, shape index: {}]   ;;  %s263_s2 = inlined_call_operand.hbm [shape: f32[1,1], index: 2, kind: output, shape index: {}]  }
   0x1   :  { %v20_v0 = vld [vmem:[%s261_s0] sm:$0xff]  ;;  %v21_v1 = vld [vmem:[%s261_s0 + $0x8] sm:$0xff] }
   0x2   :  { %v22_v2 = vld [vmem:[%s262_s1] sm:$0xff]  ;;  %v32_v3 = vmin.f32 %v20_v0, %v21_v1  ;;  %v40_v4 = vadd.f32 %v21_v1, %v20_v0  ;;  %v23_v5 = vld [vmem:[%s262_s1 + $0x8] sm:$0xff] }
   0x3   :  { %7 = vsyncpa [#allocation9], 0  ;;  %v36_v6 = vmin.f32 %v22_v2, %v23_v5  ;;  %v44_v7 = vadd.f32 %v23_v5, %v22_v2  ;;  %s229_s24 = smov 0.0   ;;  %s230_s7 = smov [#allocation8]  }
   0x4   :  { %51 = vmin.xlane.f32.xlu0 %v32_v3  ;;  %71 = vadd.xlane.f32.xlu1 %v40_v4 }
   0x8   :  { %61 = vmin.xlane.f32.xlu0 %v36_v6  ;;  %81 = vadd.xlane.f32.xlu1 %v44_v7 }
  0x8d   :  { %v52_v8 = vpop.xlane.xlu0 %51  ;;  %v72_v9 = vpop.xlane.xlu1 %71 }
  0x8e   :  { %v53_v10 = vrot.slane %v52_v8, 4  ;;  %v73_v11 = vrot.slane %v72_v9, 4 }
  0x90   :  { %v54_v12 = vmin.f32 %v52_v8, %v53_v10  ;;  %v74_v13 = vadd.f32 %v73_v11, %v72_v9 }
  0x91   :  { %v62_v14 = vpop.xlane.xlu0 %61  ;;  %v82_v15 = vpop.xlane.xlu1 %81 }
  0x92   :  { %v55_v16 = vrot.slane %v54_v12, 2  ;;  %v75_v17 = vrot.slane %v74_v13, 2  ;;  %v63_v18 = vrot.slane %v62_v14, 4  ;;  %v83_v19 = vrot.slane %v82_v15, 4 }
  0x94   :  { %v64_v20 = vmin.f32 %v62_v14, %v63_v18  ;;  %v84_v21 = vadd.f32 %v83_v19, %v82_v15  ;;  %v56_v22 = vmin.f32 %v54_v12, %v55_v16  ;;  %v76_v23 = vadd.f32 %v75_v17, %v74_v13 }
  0x96   :  { %v65_v24 = vrot.slane %v64_v20, 2  ;;  %v85_v25 = vrot.slane %v84_v21, 2  ;;  %v57_v26 = vrot.slane %v56_v22, 1  ;;  %v77_v27 = vrot.slane %v76_v23, 1 }
  0x98   :  { %v58_v28 = vmin.f32 %v56_v22, %v57_v26  ;;  %v66_v29 = vmin.f32 %v64_v20, %v65_v24  ;;  %v86_v30 = vadd.f32 %v85_v25, %v84_v21  ;;  %v78_v33 = vadd.f32 %v77_v27, %v76_v23 }
  0x9a   :  { %191 = vpush %v58_v28  ;;  %v67_v31 = vrot.slane %v66_v29, 1  ;;  %v87_v32 = vrot.slane %v86_v30, 1 }
  0x9c   :  { %v68_v34 = vmin.f32 %v66_v29, %v67_v31  ;;  %v88_v35 = vadd.f32 %v87_v32, %v86_v30 }
  0x9e   :  { %193 = vpush %v68_v34 }
  0x9f   :  { %195 = vpush %v78_v33 }
  0xa0   :  { %197 = vpush %v88_v35 }
  0xcb   :  { %s192_s0 = spop %191 }
  0xcc   :  { %v99_v36 = vstv %s192_s0  ;;  %s90_s1 = smul.f32 2048.0, %s192_s0 }
  0xcd   :  { %v100_v37 = vsub.f32 %v20_v0, %v99_v36  ;;  %v101_v38 = vsub.f32 %v21_v1, %v99_v36 }
  0xcf   :  { %s194_s17 = spop %193  ;;  %v130_v39 = vadd.f32 %v101_v38, %v100_v37 }
  0xd0   :  { %s92_s18 = smul.f32 2048.0, %s194_s17  ;;  %v104_v40 = vstv %s194_s17  ;;  %s196_s19 = spop %195 }
  0xd1   :  { %v105_v41 = vsub.f32 %v22_v2, %v104_v40  ;;  %v106_v42 = vsub.f32 %v23_v5, %v104_v40  ;;  %s91_s20 = ssub.f32 %s196_s19, %s90_s1  ;;  %134 = vadd.xlane.f32.xlu0 %v130_v39  ;;  %s198_s21 = spop %197 }
  0xd2   :  { %s93_s22 = ssub.f32 %s198_s21, %s92_s18 }
  0xd3   :  { %v132_v43 = vadd.f32 %v106_v42, %v105_v41  ;;  %v107_v44 = vmul.f32 %v105_v41, %v100_v37  ;;  %v108_v45 = vmul.f32 %v106_v42, %v101_v38 }
  0xd4   :  { %s94_s23 = smul.f32 %s93_s22, %s91_s20 }
  0xd5   :  { %143 = vadd.xlane.f32.xlu1 %v132_v43  ;;  %v109_v46 = vand.u32 2147483647, %v107_v44  ;;  %v110_v47 = vand.u32 2147483647, %v108_v45 }
  0xd6   :  { %s95_s25 = smax.f32 %s229_s24, %s94_s23 }
  0xd7   :  { %s96_s26 = smul.f32 1e-19, %s95_s25 }
  0xd9   :  { %v111_v48 = vstv %s96_s26 }
  0xda   :  { %v112_v49 = vadd.f32 %v111_v48, %v109_v46  ;;  %v113_v50 = vadd.f32 %v111_v48, %v110_v47 }
  0xdc   :  { %211 = vrsqrt.f32 %v112_v49  ;;  %vm116_vm0 = vcmp.eq.f32.partialorder %v112_v49, inf  ;;  %v119_v54 = vand.u32 2147483648, %v112_v49  ;;  %vm118_vm1 = vcmp.eq.f32.partialorder %v112_v49, 0.0 }
  0xdd   :  { %213 = vrsqrt.f32 %v113_v50  ;;  %vm123_vm2 = vcmp.eq.f32.partialorder %v113_v50, inf  ;;  %v126_v57 = vand.u32 2147483648, %v113_v50  ;;  %vm125_vm3 = vcmp.eq.f32.partialorder %v113_v50, 0.0 }
  0xe9   :  { %v212_v51 = vpop.eup %211 }
  0xea   :  { %v214_v52 = vpop.eup %213  ;;  %v115_v53 = vmul.f32 %v212_v51, %v112_v49 }
  0xeb   :  { %v122_v55 = vmul.f32 %v214_v52, %v113_v50 }
  0xec   :  { %v117_v56 = vsel %vm116_vm0, %v112_v49, %v115_v53 }
  0xed   :  { %v120_v58 = vsel %vm118_vm1, %v119_v54, %v117_v56  ;;  %v124_v59 = vsel %vm123_vm2, %v113_v50, %v122_v55 }
  0xee   :  { %v127_v60 = vsel %vm125_vm3, %v126_v57, %v124_v59 }
  0xef   :  { %v128_v61 = vadd.f32 %v127_v60, %v120_v58 }
  0xf1   :  { %153 = vadd.xlane.f32.xlu0 %v128_v61 }
 0x15a   :  { %v135_v62 = vpop.xlane.xlu0 %134 }
 0x15b   :  { %v136_v63 = vrot.slane %v135_v62, 4 }
 0x15d   :  { %v137_v0 = vadd.f32 %v136_v63, %v135_v62 }
 0x15e   :  { %v144_v1 = vpop.xlane.xlu1 %143 }
 0x15f   :  { %v138_v2 = vrot.slane %v137_v0, 2  ;;  %v145_v3 = vrot.slane %v144_v1, 4 }
 0x161   :  { %v146_v4 = vadd.f32 %v145_v3, %v144_v1  ;;  %v139_v5 = vadd.f32 %v138_v2, %v137_v0 }
 0x163   :  { %v147_v6 = vrot.slane %v146_v4, 2  ;;  %v140_v7 = vrot.slane %v139_v5, 1 }
 0x165   :  { %v148_v8 = vadd.f32 %v147_v6, %v146_v4  ;;  %v141_v9 = vadd.f32 %v140_v7, %v139_v5 }
 0x167   :  { %199 = vpush %v141_v9  ;;  %v149_v10 = vrot.slane %v148_v8, 1 }
 0x169   :  { %v150_v11 = vadd.f32 %v149_v10, %v148_v8 }
 0x16b   :  { %201 = vpush %v150_v11 }
 0x17a   :  { %v154_v12 = vpop.xlane.xlu0 %153 }
 0x17b   :  { %v155_v13 = vrot.slane %v154_v12, 4 }
 0x17d   :  { %v156_v14 = vadd.f32 %v155_v13, %v154_v12 }
 0x17f   :  { %v157_v15 = vrot.slane %v156_v14, 2 }
 0x181   :  { %v158_v16 = vadd.f32 %v157_v15, %v156_v14 }
 0x183   :  { %v159_v17 = vrot.slane %v158_v16, 1 }
 0x185   :  { %v160_v18 = vadd.f32 %v159_v17, %v158_v16 }
 0x187   :  { %203 = vpush %v160_v18 }
 0x198   :  { %s200_s27 = spop %199 }
 0x19c   :  { %s202_s28 = spop %201 }
 0x19d   :  { %s152_s29 = smul.f32 %s202_s28, %s200_s27 }
 0x19f   :  { %v163_v19 = vstv %s152_s29 }
 0x1a0   :  { %215 = vrsqrt.f32 %v163_v19  ;;  %vm166_vm4 = vcmp.eq.f32.partialorder %v163_v19, inf  ;;  %v169_v22 = vand.u32 2147483648, %v163_v19  ;;  %vm168_vm5 = vcmp.eq.f32.partialorder %v163_v19, 0.0 }
 0x1ad   :  { %v216_v20 = vpop.eup %215 }
 0x1ae   :  { %v165_v21 = vmul.f32 %v216_v20, %v163_v19 }
 0x1b0   :  { %v167_v23 = vsel %vm166_vm4, %v163_v19, %v165_v21 }
 0x1b1   :  { %v170_v24 = vsel %vm168_vm5, %v169_v22, %v167_v23 }
 0x1b2   :  { %205 = vpush %v170_v24 }
 0x1b8   :  { %s204_s30 = spop %203 }
 0x1b9   :  { %s162_s4 = smul.f32 -2.0, %s204_s30 }
 0x1e3   :  { %s206_s3 = spop %205 }
 0x1e4   :  { %v172_v25 = vstv %s206_s3 }
 0x1e5   :  { %217 = vrcp.f32 %v172_v25 }
 0x1f2   :  { %v218_v26 = vpop.eup %217 }
 0x1f3   :  { %207 = vpush %v218_v26 }
 0x224   :  { %s208_s5 = spop %207 }
 0x225   :  { %s175_s6 = smul.f32 %s208_s5, %s162_s4 }
 0x227   :  { %177 = sst [smem:[#allocation8]] %s175_s6 }
 0x228   :  { %185 = dma.smem_to_hbm %s230_s7, 16, %s263_s2, [#allocation9]  }
 0x229   :  { %227 = dma.done.wait [#allocation9], 16  }
 0x22a   :  { %228 = vsyncadd [#allocation9], 4294967280 }
 0x22b   :  { %189 = sfence }
 0x22c   :  { %190 = vsyncpa [#allocation9], 1 }

</bundles_post_ra>
